<compile_context>
chip_gen: v7x
topology: tpu7x:2x2x1
jax: 0.10.0
libtpu: 0.0.40
codegen_flags: <defaults>
</compile_context>

<pallas_src>
import jax
import jax.numpy as jnp
from jax.experimental import pallas as pl
from jax.experimental.pallas import tpu as pltpu

HIDDEN = 64   # per-tower hidden width
EMB = 128     # per-tower embedding width


def _two_tower_kernel(x_ref, w1t_ref, b1_ref, w2t_ref, b2_ref, out_ref):
    # x_ref:   (TB, Din)         bf16  [user | episode] features, natural layout
    # w1t_ref: (2*HIDDEN, Din)   bf16  block-diag layer-1 weights, transposed
    # b1_ref:  (2*HIDDEN, 1)     f32
    # w2t_ref: (2*EMB, 2*HIDDEN) bf16  block-diag layer-2 weights, transposed
    # b2_ref:  (2*EMB, 1)        f32
    # out_ref: (1, TB)           f32   cosine scores (lane-dense row)

    # Layer 1: contract the feature (minor) dims of W1^T and X so the result
    # lands batch-on-lanes without any wrapper-side transpose of X.
    h1 = jax.lax.dot_general(
        w1t_ref[...], x_ref[...],
        dimension_numbers=(((1,), (1,)), ((), ())),
        preferred_element_type=jnp.float32)                       # (2H, TB)
    h1 = jnp.maximum(h1 + b1_ref[...], 0.0)   # ReLU; Dropout(0.5) == identity in eval
    # TODO(synk): training-mode Dropout(0.5) (stochastic masking) not implemented.

    h2 = jnp.dot(w2t_ref[...], h1.astype(jnp.bfloat16),
                 preferred_element_type=jnp.float32)              # (2E, TB)
    emb = jnp.maximum(h2 + b2_ref[...], 0.0)   # [emb_u ; emb_e] stacked on sublanes

    sq = emb * emb                                                # one full-width square
    uu = jnp.sum(sq[:EMB, :], axis=0, keepdims=True)              # (1, TB)
    ee = jnp.sum(sq[EMB:, :], axis=0, keepdims=True)              # (1, TB)
    ue = jnp.sum(emb[:EMB, :] * emb[EMB:, :], axis=0, keepdims=True)

    # cosine score; eps avoids NaN/Inf when an embedding row is all zeros
    out_ref[...] = ue * jax.lax.rsqrt(uu * ee + 1e-12)


def _round_up(x, m):
    return ((x + m - 1) // m) * m


def pack_params(params):
    """One-time packing of the two towers into fused block-diagonal weights.

    Call at model load; do NOT call per forward (review: hoist wrapper packing).
    """
    uw1, ew1 = params["uw1"], params["ew1"]
    uw2, ew2 = params["uw2"], params["ew2"]
    du, de = uw1.shape[0], ew1.shape[0]
    din = du + de
    w1 = jnp.zeros((din, 2 * HIDDEN), jnp.float32)
    w1 = w1.at[:du, :HIDDEN].set(uw1).at[du:, HIDDEN:].set(ew1)
    w2 = jnp.zeros((2 * HIDDEN, 2 * EMB), jnp.float32)
    w2 = w2.at[:HIDDEN, :EMB].set(uw2).at[HIDDEN:, EMB:].set(ew2)
    b1 = jnp.concatenate([params["ub1"].reshape(-1), params["eb1"].reshape(-1)])
    b2 = jnp.concatenate([params["ub2"].reshape(-1), params["eb2"].reshape(-1)])
    return dict(
        w1t=w1.T.astype(jnp.bfloat16),                       # (2*HIDDEN, Din)
        b1c=b1.reshape(2 * HIDDEN, 1).astype(jnp.float32),
        w2t=w2.T.astype(jnp.bfloat16),                       # (2*EMB, 2*HIDDEN)
        b2c=b2.reshape(2 * EMB, 1).astype(jnp.float32),
    )


def two_tower_forward(user_features, episode_features, packed, *, tb_max=2048):
    """Eval-mode forward: cosine(user_tower(u), episode_tower(e)) -> (B, 1)."""
    B, Du = user_features.shape
    De = episode_features.shape[1]
    Din = Du + De
    w1t, b1c, w2t, b2c = packed["w1t"], packed["b1c"], packed["w2t"], packed["b2c"]
    assert w1t.shape == (2 * HIDDEN, Din), (w1t.shape, Din)

    # Single bf16 pass over the inputs: cast -> concat -> pad batch to a
    # multiple of 128 lanes.  No f32 intermediate, no wrapper transpose.
    x = jnp.concatenate([user_features.astype(jnp.bfloat16),
                         episode_features.astype(jnp.bfloat16)], axis=1)   # (B, Din)
    b128 = _round_up(B, 128)
    if b128 != B:
        x = jnp.pad(x, ((0, b128 - B), (0, 0)))

    # Batch tile: multiple of 128, large enough to amortize ~0.35us/step grid
    # overhead, small enough to bound tail padding and stay under v5e's 16 MiB
    # scoped-VMEM default.  Split so the grid has >= 2 "parallel" steps when
    # the batch allows (v7x megacore).
    tb = max(128, min((tb_max // 128) * 128, b128))
    if b128 >= 256 and b128 <= tb:
        tb = _round_up(pl.cdiv(b128, 2), 128)
    assert tb % 128 == 0, tb
    num_tiles = pl.cdiv(b128, tb)   # last tile may be partial; edge writes are masked

    flops = 2 * b128 * (Din * 2 * HIDDEN + (2 * HIDDEN) * (2 * EMB))
    bytes_accessed = (x.size * 2 + b128 * 4                     # streamed in / out
                      + w1t.size * 2 + w2t.size * 2             # VMEM-resident, DMA'd once
                      + b1c.size * 4 + b2c.size * 4)

    out = pl.pallas_call(
        _two_tower_kernel,
        out_shape=jax.ShapeDtypeStruct((1, b128), jnp.float32),
        grid=(num_tiles,),
        in_specs=[
            pl.BlockSpec((tb, Din), lambda i: (i, 0)),              # features: tiled over batch
            pl.BlockSpec((2 * HIDDEN, Din), lambda i: (0, 0)),      # weights/biases: constant
            pl.BlockSpec((2 * HIDDEN, 1), lambda i: (0, 0)),        #   index_map -> fetched once,
            pl.BlockSpec((2 * EMB, 2 * HIDDEN), lambda i: (0, 0)),  #   VMEM-resident across steps
            pl.BlockSpec((2 * EMB, 1), lambda i: (0, 0)),
        ],
        out_specs=pl.BlockSpec((1, tb), lambda i: (0, i)),          # lane-dense score row
        compiler_params=pltpu.CompilerParams(
            dimension_semantics=("parallel",)),
        cost_estimate=pl.CostEstimate(
            flops=flops, transcendentals=b128, bytes_accessed=bytes_accessed),
    )(x, w1t, b1c, w2t, b2c)

    return out[0, :B].reshape(B, 1)


def init_params(key, user_dim, episode_dim, hidden=HIDDEN, emb=EMB):
    ks = jax.random.split(key, 4)

    def lin(k, fan_in, fan_out):
        # PyTorch-style uniform(-1/sqrt(fan_in), 1/sqrt(fan_in)); stored as (in, out)
        bound = 1.0 / jnp.sqrt(fan_in)
        kw, kb = jax.random.split(k)
        w = jax.random.uniform(kw, (fan_in, fan_out), jnp.float32, -bound, bound)
        b = jax.random.uniform(kb, (fan_out,), jnp.float32, -bound, bound)
        return w, b

    uw1, ub1 = lin(ks[0], user_dim, hidden)
    uw2, ub2 = lin(ks[1], hidden, emb)
    ew1, eb1 = lin(ks[2], episode_dim, hidden)
    ew2, eb2 = lin(ks[3], hidden, emb)
    return dict(uw1=uw1, ub1=ub1, uw2=uw2, ub2=ub2,
                ew1=ew1, eb1=eb1, ew2=ew2, eb2=eb2)


if __name__ == "__main__":
    key = jax.random.PRNGKey(0)
    k_u, k_e, k_p = jax.random.split(key, 3)

    B, user_dim, episode_dim = 8, 32, 16
    user_features = jax.random.normal(k_u, (B, user_dim), jnp.float32)
    episode_features = jax.random.normal(k_e, (B, episode_dim), jnp.float32)
    params = init_params(k_p, user_dim, episode_dim)
    packed = pack_params(params)          # one-time weight packing (model load)

    scores = two_tower_forward(user_features, episode_features, packed)
    jax.block_until_ready(scores)

    # Reference in plain JAX, with the same bf16 matmul operands / f32 accumulate
    # as the kernel so the comparison isolates structural correctness.
    # Precision contract: matmuls run in bf16 with f32 accumulation (inference).
    def ref(u, e, p):
        def mm(x, w):
            return jnp.dot(x.astype(jnp.bfloat16), w.astype(jnp.bfloat16),
                           preferred_element_type=jnp.float32)
        hu = jnp.maximum(mm(u, p["uw1"]) + p["ub1"], 0.0)
        eu = jnp.maximum(mm(hu, p["uw2"]) + p["ub2"], 0.0)
        he = jnp.maximum(mm(e, p["ew1"]) + p["eb1"], 0.0)
        ee = jnp.maximum(mm(he, p["ew2"]) + p["eb2"], 0.0)
        eu = eu / jnp.sqrt(jnp.sum(eu * eu, axis=1, keepdims=True) + 1e-12)
        ee = ee / jnp.sqrt(jnp.sum(ee * ee, axis=1, keepdims=True) + 1e-12)
        return jnp.sum(eu * ee, axis=1, keepdims=True)

    expected = ref(user_features, episode_features, params)
    assert scores.shape == (B, 1), scores.shape
    assert jnp.allclose(scores, expected, atol=2e-3, rtol=2e-3), (
        jnp.max(jnp.abs(scores - expected)))
    print("KERNEL_OK")
</pallas_src>

<mosaic_0001>
module attributes {stable_mosaic.version = 11 : i64} {
  func.func @_two_tower_kernel(%arg0: i32, %arg1: memref<128x48xbf16, #tpu.memory_space<vmem>>, %arg2: memref<128x48xbf16, #tpu.memory_space<vmem>>, %arg3: memref<128x1xf32, #tpu.memory_space<vmem>>, %arg4: memref<256x128xbf16, #tpu.memory_space<vmem>>, %arg5: memref<256x1xf32, #tpu.memory_space<vmem>>, %arg6: memref<1x128xf32, #tpu.memory_space<vmem>>) attributes {dimension_semantics = [#tpu.dimension_semantics<parallel>], iteration_bounds = array<i64: 1>, scalar_prefetch = 0 : i64, scratch_operands = 0 : i64, tpu.core_type = #tpu.core_type<tc>, window_params = [{transform_indices = @transform_0, window_bounds = array<i64: 128, 48>}, {pipeline_mode = #tpu.pipeline_mode<synchronous>, transform_indices = @transform_1, window_bounds = array<i64: 128, 48>}, {pipeline_mode = #tpu.pipeline_mode<synchronous>, transform_indices = @transform_2, window_bounds = array<i64: 128, 1>}, {pipeline_mode = #tpu.pipeline_mode<synchronous>, transform_indices = @transform_3, window_bounds = array<i64: 256, 128>}, {pipeline_mode = #tpu.pipeline_mode<synchronous>, transform_indices = @transform_4, window_bounds = array<i64: 256, 1>}, {transform_indices = @transform_5, window_bounds = array<i64: 1, 128>}]} {
    %c0 = arith.constant 0 : index
    %c0_0 = arith.constant 0 : index
    %0 = vector.load %arg2[%c0, %c0_0] : memref<128x48xbf16, #tpu.memory_space<vmem>>, vector<128x48xbf16>
    %c0_1 = arith.constant 0 : index
    %c0_2 = arith.constant 0 : index
    %1 = vector.load %arg1[%c0_1, %c0_2] : memref<128x48xbf16, #tpu.memory_space<vmem>>, vector<128x48xbf16>
    %cst = arith.constant dense<0.000000e+00> : vector<128x128xf32>
    %2 = tpu.matmul %0, %1, %cst {dimension_numbers = #tpu.dot_dimension_numbers<[1], [1], [0], [0], [0, 0, 1, 0], [], []>} : vector<128x48xbf16>, vector<128x48xbf16>, vector<128x128xf32> -> vector<128x128xf32>
    %c0_3 = arith.constant 0 : index
    %c0_4 = arith.constant 0 : index
    %3 = vector.load %arg3[%c0_3, %c0_4] : memref<128x1xf32, #tpu.memory_space<vmem>>, vector<128x1xf32>
    %4 = vector.broadcast %3 : vector<128x1xf32> to vector<128x128xf32>
    %5 = arith.addf %2, %4 : vector<128x128xf32>
    %cst_5 = arith.constant 0.000000e+00 : f32
    %6 = vector.broadcast %cst_5 : f32 to vector<128x128xf32>
    %7 = arith.maximumf %5, %6 : vector<128x128xf32>
    %c0_6 = arith.constant 0 : index
    %c0_7 = arith.constant 0 : index
    %8 = vector.load %arg4[%c0_6, %c0_7] : memref<256x128xbf16, #tpu.memory_space<vmem>>, vector<256x128xbf16>
    %9 = arith.truncf %7 : vector<128x128xf32> to vector<128x128xbf16>
    %cst_8 = arith.constant dense<0.000000e+00> : vector<256x128xf32>
    %10 = tpu.matmul %8, %9, %cst_8 {dimension_numbers = #tpu.dot_dimension_numbers<[1], [0], [0], [1], [0, 0, 1, 1], [], []>} : vector<256x128xbf16>, vector<128x128xbf16>, vector<256x128xf32> -> vector<256x128xf32>
    %c0_9 = arith.constant 0 : index
    %c0_10 = arith.constant 0 : index
    %11 = vector.load %arg5[%c0_9, %c0_10] : memref<256x1xf32, #tpu.memory_space<vmem>>, vector<256x1xf32>
    %12 = vector.broadcast %11 : vector<256x1xf32> to vector<256x128xf32>
    %13 = arith.addf %10, %12 : vector<256x128xf32>
    %cst_11 = arith.constant 0.000000e+00 : f32
    %14 = vector.broadcast %cst_11 : f32 to vector<256x128xf32>
    %15 = arith.maximumf %13, %14 : vector<256x128xf32>
    %16 = arith.mulf %15, %15 : vector<256x128xf32>
    %17 = vector.extract_strided_slice %16 {offsets = [0, 0], sizes = [128, 128], strides = [1, 1]} : vector<256x128xf32> to vector<128x128xf32>
    %cst_12 = arith.constant dense<0.000000e+00> : vector<128xf32>
    %18 = vector.multi_reduction <add>, %17, %cst_12 [0] : vector<128x128xf32> to vector<128xf32>
    %19 = vector.shape_cast %18 : vector<128xf32> to vector<1x128xf32>
    %20 = vector.extract_strided_slice %16 {offsets = [128, 0], sizes = [128, 128], strides = [1, 1]} : vector<256x128xf32> to vector<128x128xf32>
    %cst_13 = arith.constant dense<0.000000e+00> : vector<128xf32>
    %21 = vector.multi_reduction <add>, %20, %cst_13 [0] : vector<128x128xf32> to vector<128xf32>
    %22 = vector.shape_cast %21 : vector<128xf32> to vector<1x128xf32>
    %23 = vector.extract_strided_slice %15 {offsets = [0, 0], sizes = [128, 128], strides = [1, 1]} : vector<256x128xf32> to vector<128x128xf32>
    %24 = vector.extract_strided_slice %15 {offsets = [128, 0], sizes = [128, 128], strides = [1, 1]} : vector<256x128xf32> to vector<128x128xf32>
    %25 = arith.mulf %23, %24 : vector<128x128xf32>
    %cst_14 = arith.constant dense<0.000000e+00> : vector<128xf32>
    %26 = vector.multi_reduction <add>, %25, %cst_14 [0] : vector<128x128xf32> to vector<128xf32>
    %27 = vector.shape_cast %26 : vector<128xf32> to vector<1x128xf32>
    %28 = arith.mulf %19, %22 : vector<1x128xf32>
    %cst_15 = arith.constant 9.99999996E-13 : f32
    %29 = vector.broadcast %cst_15 : f32 to vector<1x128xf32>
    %30 = arith.addf %28, %29 : vector<1x128xf32>
    %31 = math.rsqrt %30 : vector<1x128xf32>
    %32 = arith.mulf %27, %31 : vector<1x128xf32>
    %c0_16 = arith.constant 0 : index
    %c0_17 = arith.constant 0 : index
    %33 = vector.load %arg6[%c0_16, %c0_17] : memref<1x128xf32, #tpu.memory_space<vmem>>, vector<1x128xf32>
    tpu.vector_store %arg6[%c0_16, %c0_17], %32 {strides = array<i32>} : memref<1x128xf32, #tpu.memory_space<vmem>>, vector<1x128xf32>,
    return
  }
  func.func @transform_0(%arg0: i32) -> (i32, i32) {
    %c0_i32 = arith.constant 0 : i32
    %c0_i32_0 = arith.constant 0 : i32
    return %arg0, %c0_i32 : i32, i32
  }
  func.func @transform_1(%arg0: i32) -> (i32, i32) {
    %c0_i32 = arith.constant 0 : i32
    %c0_i32_0 = arith.constant 0 : i32
    %c0_i32_1 = arith.constant 0 : i32
    return %c0_i32, %c0_i32_0 : i32, i32
  }
  func.func @transform_2(%arg0: i32) -> (i32, i32) {
    %c0_i32 = arith.constant 0 : i32
    %c0_i32_0 = arith.constant 0 : i32
    %c0_i32_1 = arith.constant 0 : i32
    return %c0_i32, %c0_i32_0 : i32, i32
  }
  func.func @transform_3(%arg0: i32) -> (i32, i32) {
    %c0_i32 = arith.constant 0 : i32
    %c0_i32_0 = arith.constant 0 : i32
    %c0_i32_1 = arith.constant 0 : i32
    return %c0_i32, %c0_i32_0 : i32, i32
  }
  func.func @transform_4(%arg0: i32) -> (i32, i32) {
    %c0_i32 = arith.constant 0 : i32
    %c0_i32_0 = arith.constant 0 : i32
    %c0_i32_1 = arith.constant 0 : i32
    return %c0_i32, %c0_i32_0 : i32, i32
  }
  func.func @transform_5(%arg0: i32) -> (i32, i32) {
    %c0_i32 = arith.constant 0 : i32
    %c0_i32_0 = arith.constant 0 : i32
    return %c0_i32, %arg0 : i32, i32
  }
}

</mosaic_0001>

<bundles_post_ra>
// kernel: tpu_custom_call.1
= control target key start
LH: loop header
LB: loop body
LE: loop exit
PB: predicated region body
PF: predicated region fallthrough
CT: control target
= control target key end

     0   :  { %vm230_vm0 = vcmask 392192   ;;  %v1273_v3 = vmov 0   ;;  %s1701_s0 = inlined_call_operand.vmem [shape: bf16[128,48], index: 0, kind: input, shape index: {}]   ;;  %s1702_s1 = inlined_call_operand.vmem [shape: bf16[128,48], index: 1, kind: input, shape index: {}]   ;;  %s1703_s2 = inlined_call_operand.vmem [shape: f32[128,1], index: 2, kind: input, shape index: {}]   ;;  %s1704_s3 = inlined_call_operand.vmem [shape: bf16[256,128], index: 3, kind: input, shape index: {}]   ;;  %s1705_s4 = inlined_call_operand.vmem [shape: f32[256,1], index: 4, kind: input, shape index: {}]   ;;  %s1706_s5 = inlined_call_operand.hbm [shape: f32[1,128], index: 5, kind: output, shape index: {}]  }
   0x1   :  { %v1215_v0 = vld [vmem:[%s1701_s0] sm:$0xff]   ;;  %v1216_v1 = vld [vmem:[%s1701_s0 + $0x8] sm:$0xff]   ;;  %1213 = vset.pattern.permute.xlu0 %v1273_v3  ;;  %1214 = vset.pattern.permute.xlu1 %v1273_v3  ;;  %v1217_v6 = vld [vmem:[%s1701_s0 + $0x10] sm:$0xff]  }
   0x2   :  { %1203 = vmatprep.subr.msk.bf16.mxu0 %vm230_vm0, %v1215_v0  ;;  %v256_v2 = vsel %vm230_vm0, %v1215_v0, 0  ;;  %v54_v4 = vld [vmem:[%s1703_s2] sm:$0xff]  ;;  %v259_v5 = vsel %vm230_vm0, %v1216_v1, 0  ;;  %v56_v7 = vld [vmem:[%s1703_s2 + $0x10] sm:$0xff]  ;;  %v55_v8 = vld [vmem:[%s1703_s2 + $0x8] sm:$0xff]  ;;  %v262_v13 = vsel %vm230_vm0, %v1217_v6, 0 }
   0x3   :  { %1124 = vmatpush3.bf16.xpose.msra.mxu0 %v256_v2  ;;  %72 = vperm.xlu0 %1213, %v54_v4   ;;  %v57_v9 = vld [vmem:[%s1703_s2 + $0x18] sm:$0xff]  ;;  %v1223_v10 = vld [vmem:[%s1702_s1] sm:$0xff]   ;;  %v59_v12 = vld [vmem:[%s1703_s2 + $0x28] sm:$0xff] }
   0x4   :  { %1204 = vmatprep.subr.msk.bf16.mxu0 %vm230_vm0, %v1216_v1  ;;  %82 = vperm.xlu1 %1214, %v56_v7   ;;  %v58_v11 = vld [vmem:[%s1703_s2 + $0x20] sm:$0xff]  ;;  %v1218_v14 = vld [vmem:[%s1701_s0 + $0x18] sm:$0xff]   ;;  %v60_v15 = vld [vmem:[%s1703_s2 + $0x30] sm:$0xff] }
   0x5   :  { %1139 = vmatprep.mubr.msk.bf16.mxu0 %vm230_vm0, %v1223_v10  ;;  %v61_v16 = vld [vmem:[%s1703_s2 + $0x38] sm:$0xff]  ;;  %v62_v17 = vld [vmem:[%s1703_s2 + $0x40] sm:$0xff]  ;;  %v63_v18 = vld [vmem:[%s1703_s2 + $0x48] sm:$0xff]  ;;  %v265_v19 = vsel %vm230_vm0, %v1218_v14, 0 }
   0x6   :  { %v1219_v20 = vld [vmem:[%s1701_s0 + $0x20] sm:$0xff]   ;;  %v64_v21 = vld [vmem:[%s1703_s2 + $0x50] sm:$0xff]  ;;  %v65_v22 = vld [vmem:[%s1703_s2 + $0x58] sm:$0xff] }
   0x7   :  { %77 = vperm.xlu0 %1213, %v55_v8   ;;  %v1220_v23 = vld [vmem:[%s1701_s0 + $0x28] sm:$0xff]   ;;  %v66_v24 = vld [vmem:[%s1703_s2 + $0x60] sm:$0xff]  ;;  %v268_v26 = vsel %vm230_vm0, %v1219_v20, 0  ;;  %v68_v28 = vld [vmem:[%s1703_s2 + $0x70] sm:$0xff] }
   0x8   :  { %87 = vperm.xlu1 %1214, %v57_v9   ;;  %v67_v25 = vld [vmem:[%s1703_s2 + $0x68] sm:$0xff]  ;;  %v271_v27 = vsel %vm230_vm0, %v1220_v23, 0  ;;  %v69_v29 = vld [vmem:[%s1703_s2 + $0x78] sm:$0xff]  ;;  %v432_v30 = vld [vmem:[%s1705_s4] sm:$0xff] }
   0x9   :  { %v433_v31 = vld [vmem:[%s1705_s4 + $0x8] sm:$0xff]  ;;  %v1221_v32 = vld [vmem:[%s1701_s0 + $0x30] sm:$0xff]   ;;  %v448_v33 = vld [vmem:[%s1705_s4 + $0x80] sm:$0xff] }
   0xa   :  { %v449_v34 = vld [vmem:[%s1705_s4 + $0x88] sm:$0xff] }
   0xb   :  { %1126 = vmatpush3.bf16.xpose.msra.mxu0 %v259_v5  ;;  %92 = vperm.xlu0 %1213, %v58_v11  }
   0xc   :  { %1205 = vmatprep.subr.msk.bf16.mxu0 %vm230_vm0, %v1217_v6  ;;  %97 = vperm.xlu1 %1214, %v59_v12  }
   0xf   :  { %102 = vperm.xlu0 %1213, %v60_v15  }
  0x10   :  { %107 = vperm.xlu1 %1214, %v61_v16  }
  0x13   :  { %1128 = vmatpush3.bf16.xpose.msra.mxu0 %v262_v13  ;;  %112 = vperm.xlu0 %1213, %v62_v17  }
  0x14   :  { %1206 = vmatprep.subr.msk.bf16.mxu0 %vm230_vm0, %v1218_v14  ;;  %117 = vperm.xlu1 %1214, %v63_v18  }
  0x17   :  { %122 = vperm.xlu0 %1213, %v64_v21  }
  0x18   :  { %127 = vperm.xlu1 %1214, %v65_v22  }
  0x1b   :  { %1130 = vmatpush3.bf16.xpose.msra.mxu0 %v265_v19  ;;  %132 = vperm.xlu0 %1213, %v66_v24  }
  0x1c   :  { %1207 = vmatprep.subr.msk.bf16.mxu0 %vm230_vm0, %v1219_v20  ;;  %137 = vperm.xlu1 %1214, %v67_v25  }
  0x1f   :  { %142 = vperm.xlu0 %1213, %v68_v28  }
  0x20   :  { %147 = vperm.xlu1 %1214, %v69_v29  }
  0x23   :  { %1132 = vmatpush3.bf16.xpose.msra.mxu0 %v268_v26  ;;  %466 = vperm.xlu0 %1213, %v432_v30  }
  0x24   :  { %1208 = vmatprep.subr.msk.bf16.mxu0 %vm230_vm0, %v1220_v23  ;;  %471 = vperm.xlu1 %1214, %v433_v31  }
  0x25   :  { %10 = vsyncpa [#allocation3], 0  ;;  %v434_v35 = vld [vmem:[%s1705_s4 + $0x10] sm:$0xff]  ;;  %v274_v37 = vsel %vm230_vm0, %v1221_v32, 0  ;;  %v1222_v38 = vld [vmem:[%s1701_s0 + $0x38] sm:$0xff]  }
  0x26   :  { %v450_v36 = vld [vmem:[%s1705_s4 + $0x90] sm:$0xff]  ;;  %v435_v39 = vld [vmem:[%s1705_s4 + $0x18] sm:$0xff]  ;;  %v436_v41 = vld [vmem:[%s1705_s4 + $0x20] sm:$0xff]  ;;  %v277_v43 = vsel %vm230_vm0, %v1222_v38, 0 }
  0x27   :  { %546 = vperm.xlu0 %1213, %v448_v33   ;;  %v451_v40 = vld [vmem:[%s1705_s4 + $0x98] sm:$0xff]  ;;  %v452_v42 = vld [vmem:[%s1705_s4 + $0xa0] sm:$0xff]  ;;  %v437_v44 = vld [vmem:[%s1705_s4 + $0x28] sm:$0xff] }
  0x28   :  { %551 = vperm.xlu1 %1214, %v449_v34   ;;  %v453_v45 = vld [vmem:[%s1705_s4 + $0xa8] sm:$0xff]  ;;  %v438_v46 = vld [vmem:[%s1705_s4 + $0x30] sm:$0xff]  ;;  %v439_v50 = vld [vmem:[%s1705_s4 + $0x38] sm:$0xff] }
  0x29   :  { %v1224_v47 = vld [vmem:[%s1702_s1 + $0x8] sm:$0xff]   ;;  %v454_v48 = vld [vmem:[%s1705_s4 + $0xb0] sm:$0xff]  ;;  %v455_v51 = vld [vmem:[%s1705_s4 + $0xb8] sm:$0xff] }
  0x2a   :  { %v1225_v49 = vld [vmem:[%s1702_s1 + $0x10] sm:$0xff]   ;;  %v440_v52 = vld [vmem:[%s1705_s4 + $0x40] sm:$0xff]  ;;  %v1226_v53 = vld [vmem:[%s1702_s1 + $0x18] sm:$0xff]  }
  0x2b   :  { %1134 = vmatpush3.bf16.xpose.msra.mxu0 %v271_v27  ;;  %476 = vperm.xlu0 %1213, %v434_v35   ;;  %v456_v54 = vld [vmem:[%s1705_s4 + $0xc0] sm:$0xff]  ;;  %v441_v56 = vld [vmem:[%s1705_s4 + $0x48] sm:$0xff]  ;;  %v442_v58 = vld [vmem:[%s1705_s4 + $0x50] sm:$0xff] }
  0x2c   :  { %1209 = vmatprep.subr.msk.bf16.mxu0 %vm230_vm0, %v1221_v32  ;;  %556 = vperm.xlu1 %1214, %v450_v36   ;;  %v1227_v55 = vld [vmem:[%s1702_s1 + $0x20] sm:$0xff]   ;;  %v457_v57 = vld [vmem:[%s1705_s4 + $0xc8] sm:$0xff]  ;;  %v458_v60 = vld [vmem:[%s1705_s4 + $0xd0] sm:$0xff] }
  0x2d   :  { %v1228_v59 = vld [vmem:[%s1702_s1 + $0x28] sm:$0xff]   ;;  %v1229_v61 = vld [vmem:[%s1702_s1 + $0x30] sm:$0xff]   ;;  %v443_v62 = vld [vmem:[%s1705_s4 + $0x58] sm:$0xff] }
  0x2e   :  { %v459_v63 = vld [vmem:[%s1705_s4 + $0xd8] sm:$0xff]  ;;  %v444_v0 = vld [vmem:[%s1705_s4 + $0x60] sm:$0xff]  ;;  %v445_v3 = vld [vmem:[%s1705_s4 + $0x68] sm:$0xff] }
  0x2f   :  { %481 = vperm.xlu0 %1213, %v435_v39   ;;  %v1230_v1 = vld [vmem:[%s1702_s1 + $0x38] sm:$0xff]   ;;  %v460_v2 = vld [vmem:[%s1705_s4 + $0xe0] sm:$0xff]  ;;  %v461_v4 = vld [vmem:[%s1705_s4 + $0xe8] sm:$0xff] }
  0x30   :  { %561 = vperm.xlu1 %1214, %v451_v40   ;;  %v446_v5 = vld [vmem:[%s1705_s4 + $0x70] sm:$0xff]  ;;  %v447_v7 = vld [vmem:[%s1705_s4 + $0x78] sm:$0xff]  ;;  %v1231_v9 = vld [vmem:[%s1704_s3] sm:$0xff]  }
  0x31   :  { %v462_v6 = vld [vmem:[%s1705_s4 + $0xf0] sm:$0xff]  ;;  %v463_v8 = vld [vmem:[%s1705_s4 + $0xf8] sm:$0xff]  ;;  %1171 = vmatprep.mubr.bf16.mxu1 %v1231_v9 }
  0x33   :  { %1136 = vmatpush3.bf16.xpose.msra.mxu0 %v274_v37  ;;  %486 = vperm.xlu0 %1213, %v436_v41  }
  0x34   :  { %1210 = vmatprep.subr.msk.bf16.mxu0 %vm230_vm0, %v1222_v38  ;;  %566 = vperm.xlu1 %1214, %v452_v42  }
  0x37   :  { %491 = vperm.xlu0 %1213, %v437_v44  }
  0x38   :  { %571 = vperm.xlu1 %1214, %v453_v45  }
  0x3b   :  { %1138 = vmatpush3.bf16.xpose.msra.mxu0 %v277_v43  ;;  %496 = vperm.xlu0 %1213, %v438_v46  }
  0x3c   :  { %576 = vperm.xlu1 %1214, %v454_v48  }
  0x3f   :  { %501 = vperm.xlu0 %1213, %v439_v50  }
  0x40   :  { %581 = vperm.xlu1 %1214, %v455_v51  }
  0x42   :  { %1140 = vmatmul.mubr.msk.bf16.vlgmr.msra.gmra.mrb[0].mxu0 %vm230_vm0, %v1224_v47 }
  0x43   :  { %1143 = vmatprep.mubr.msk.bf16.mxu0 %vm230_vm0, %v1225_v49  ;;  %506 = vperm.xlu0 %1213, %v440_v52  }
  0x44   :  { %586 = vperm.xlu1 %1214, %v456_v54  }
  0x47   :  { %511 = vperm.xlu0 %1213, %v441_v56  }
  0x48   :  { %591 = vperm.xlu1 %1214, %v457_v57  }
  0x4a   :  { %1144 = vmatmul.mubr.msk.bf16.gmra.mrb[4].mxu0 %vm230_vm0, %v1226_v53 }
  0x4b   :  { %1147 = vmatprep.mubr.msk.bf16.mxu0 %vm230_vm0, %v1227_v55  ;;  %516 = vperm.xlu0 %1213, %v442_v58  }
  0x4c   :  { %596 = vperm.xlu1 %1214, %v458_v60  }
  0x4f   :  { %521 = vperm.xlu0 %1213, %v443_v62  }
  0x50   :  { %601 = vperm.xlu1 %1214, %v459_v63  }
  0x52   :  { %1148 = vmatmul.mubr.msk.bf16.gmra.mrb[8].mxu0 %vm230_vm0, %v1228_v59 }
  0x53   :  { %1151 = vmatprep.mubr.msk.bf16.mxu0 %vm230_vm0, %v1229_v61  ;;  %526 = vperm.xlu0 %1213, %v444_v0  }
  0x54   :  { %606 = vperm.xlu1 %1214, %v460_v2  }
  0x57   :  { %531 = vperm.xlu0 %1213, %v445_v3  }
  0x58   :  { %611 = vperm.xlu1 %1214, %v461_v4  }
  0x5a   :  { %1152 = vmatmul.mubr.msk.bf16.gmra.mrb[12].mxu0 %vm230_vm0, %v1230_v1 }
  0x5b   :  { %536 = vperm.xlu0 %1213, %v446_v5  }
  0x5c   :  { %616 = vperm.xlu1 %1214, %v462_v6  }
  0x5f   :  { %541 = vperm.xlu0 %1213, %v447_v7  }
  0x60   :  { %621 = vperm.xlu1 %1214, %v463_v8  }
  0x82   :  { %v73_v10 = vpop.permute.xlu0 %72 }
  0x83   :  { %v83_v11 = vpop.permute.xlu1 %82 }
  0x86   :  { %v78_v12 = vpop.permute.xlu0 %77 }
  0x87   :  { %v88_v13 = vpop.permute.xlu1 %87 }
  0x8a   :  { %v93_v14 = vpop.permute.xlu0 %92 }
  0x8b   :  { %v98_v15 = vpop.permute.xlu1 %97 }
  0x8e   :  { %v103_v16 = vpop.permute.xlu0 %102 }
  0x8f   :  { %v108_v20 = vpop.permute.xlu1 %107 }
  0x92   :  { %v113_v28 = vpop.permute.xlu0 %112 }
  0x93   :  { %v118_v32 = vpop.permute.xlu1 %117 }
  0x96   :  { %v123_v41 = vpop.permute.xlu0 %122 }
  0x97   :  { %v128_v45 = vpop.permute.xlu1 %127 }
  0x9a   :  { %v133_v53 = vpop.permute.xlu0 %132 }
  0x9b   :  { %v138_v58 = vpop.permute.xlu1 %137 }
  0x9e   :  { %v143_v1 = vpop.permute.xlu0 %142 }
  0x9f   :  { %v148_v6 = vpop.permute.xlu1 %147 }
 0x115   :  { %v1141_v17 = vpop.f32.mrb[0].mxu0 }
 0x116   :  { %v322_v18 = vadd.f32 %v1141_v17, %v83_v11  ;;  %v313_v19 = vpop.f32.mrb[1].mxu0 }
 0x117   :  { %v314_v21 = vadd.f32 %v313_v19, %v73_v10  ;;  %v1142_v22 = vpop.f32.mrb[2].mxu0  ;;  %v1233_v19 = vld [vmem:[%s1704_s3 + $0x10] sm:$0xff]  }
 0x118   :  { %v325_v23 = vadd.f32 %v1142_v22, %v88_v13  ;;  %v316_v24 = vpop.f32.mrb[3].mxu0  ;;  %v378_v26 = vmax.f32 %v322_v18, 0.0  ;;  %v1232_v18 = vld [vmem:[%s1704_s3 + $0x8] sm:$0xff]  }
 0x119   :  { %v317_v25 = vadd.f32 %v316_v24, %v78_v12  ;;  %v376_v29 = vmax.f32 %v314_v21, 0.0  ;;  %v1235_v21 = vld [vmem:[%s1704_s3 + $0x20] sm:$0xff]   ;;  %v1236_v22 = vld [vmem:[%s1704_s3 + $0x28] sm:$0xff]   ;;  %v1238_v24 = vld [vmem:[%s1704_s3 + $0x38] sm:$0xff]  }
 0x11a   :  { %v379_v27 = vmax.f32 %v325_v23, 0.0  ;;  %v1237_v23 = vld [vmem:[%s1704_s3 + $0x30] sm:$0xff]  }
 0x11b   :  { %v377_v30 = vmax.f32 %v317_v25, 0.0  ;;  %v1239_v25 = vld [vmem:[%s1704_s3 + $0x40] sm:$0xff]  }
 0x11c   :  { %v425_v31 = vpack.c.bf16 %v379_v27, %v378_v26  ;;  %v1240_v26 = vld [vmem:[%s1704_s3 + $0x48] sm:$0xff]   ;;  %v1241_v27 = vld [vmem:[%s1704_s3 + $0x50] sm:$0xff]  }
 0x11d   :  { %v1145_v33 = vpop.f32.mrb[4].mxu0  ;;  %v424_v34 = vpack.c.bf16 %v377_v30, %v376_v29  ;;  %v1243_v29 = vld [vmem:[%s1704_s3 + $0x60] sm:$0xff]   ;;  %v1244_v30 = vld [vmem:[%s1704_s3 + $0x68] sm:$0xff]  }
 0x11e   :  { %v338_v35 = vadd.f32 %v1145_v33, %v103_v16  ;;  %v329_v36 = vpop.f32.mrb[5].mxu0  ;;  %v467_v33 = vpop.permute.xlu0 %466 }
 0x11f   :  { %v330_v37 = vadd.f32 %v329_v36, %v93_v14  ;;  %v1146_v38 = vpop.f32.mrb[6].mxu0  ;;  %1155 = vmatprep.subr.bf16.mxu1 %v424_v34 }
 0x120   :  { %v341_v39 = vadd.f32 %v1146_v38, %v108_v20  ;;  %v332_v40 = vpop.f32.mrb[7].mxu0  ;;  %1156 = vmatpush3.bf16.msra.mxu1 %v424_v34  ;;  %v382_v43 = vmax.f32 %v338_v35, 0.0  ;;  %v1234_v20 = vld [vmem:[%s1704_s3 + $0x18] sm:$0xff]  }
 0x121   :  { %v333_v42 = vadd.f32 %v332_v40, %v98_v15  ;;  %1157 = vmatprep.subr.bf16.mxu1 %v425_v31  ;;  %v380_v46 = vmax.f32 %v330_v37, 0.0 }
 0x122   :  { %v383_v44 = vmax.f32 %v341_v39, 0.0  ;;  %v1569_v34 = vpop.permute.xlu0 %546  ;;  %v472_v39 = vpop.permute.xlu1 %471 }
 0x123   :  { %v381_v47 = vmax.f32 %v333_v42, 0.0 }
 0x124   :  { %v427_v48 = vpack.c.bf16 %v383_v44, %v382_v43  ;;  %1158 = vmatpush3.bf16.msra.mxu1 %v425_v31  ;;  %v1245_v31 = vld [vmem:[%s1704_s3 + $0x70] sm:$0xff]  }
 0x125   :  { %v426_v49 = vpack.c.bf16 %v381_v47, %v380_v46  ;;  %v1149_v50 = vpop.f32.mrb[8].mxu0 }
 0x126   :  { %v354_v51 = vadd.f32 %v1149_v50, %v123_v41  ;;  %v345_v52 = vpop.f32.mrb[9].mxu0  ;;  %v477_v35 = vpop.permute.xlu0 %476 }
 0x127   :  { %v346_v54 = vadd.f32 %v345_v52, %v113_v28  ;;  %v1150_v55 = vpop.f32.mrb[10].mxu0  ;;  %1159 = vmatprep.subr.bf16.mxu1 %v426_v49  ;;  %v1242_v28 = vld [vmem:[%s1704_s3 + $0x58] sm:$0xff]   ;;  %v1571_v41 = vpop.permute.xlu1 %551 }
 0x128   :  { %v357_v56 = vadd.f32 %v1150_v55, %v128_v45  ;;  %v348_v57 = vpop.f32.mrb[11].mxu0  ;;  %1160 = vmatpush3.bf16.msra.mxu1 %v426_v49  ;;  %v386_v60 = vmax.f32 %v354_v51, 0.0 }
 0x129   :  { %v349_v59 = vadd.f32 %v348_v57, %v118_v32  ;;  %1161 = vmatprep.subr.bf16.mxu1 %v427_v48  ;;  %v384_v62 = vmax.f32 %v346_v54, 0.0  ;;  %v1246_v32 = vld [vmem:[%s1704_s3 + $0x78] sm:$0xff]   ;;  %s1274_s3 = smov [#allocation2]  }
 0x12a   :  { %v387_v61 = vmax.f32 %v357_v56, 0.0  ;;  %v482_v36 = vpop.permute.xlu0 %481  ;;  %s1035_s16 = sshll.u32 %s1274_s3, 4  ;;  %s1036_s16 = int_to_ptr.vmem [resolvable:$true] %s1035_s16 }
 0x12b   :  { %v385_v63 = vmax.f32 %v349_v59, 0.0  ;;  %v1573_v43 = vpop.permute.xlu1 %556  ;;  %s1249_s17 = scalar_lea.vmem %s1036_s16, 16  ;;  %s1253_s18 = scalar_lea.vmem %s1036_s16, 32 }
 0x12c   :  { %v429_v0 = vpack.c.bf16 %v387_v61, %v386_v60  ;;  %1162 = vmatpush3.bf16.msra.mxu1 %v427_v48  ;;  %p1250_p0 = scmp.ne.s32.totalorder %s1036_s16, %s1249_s17  ;;  %p1254_p1 = scmp.lt.s32.totalorder %s1036_s16, %s1036_s16 }
 0x12d   :  { %v428_v2 = vpack.c.bf16 %v385_v63, %v384_v62  ;;  %v1153_v3 = vpop.f32.mrb[12].mxu0  ;;  %p1255_p2 = scmp.lt.s32.totalorder %s1253_s18, %s1249_s17 }
 0x12e   :  { %v370_v4 = vadd.f32 %v1153_v3, %v143_v1  ;;  %v361_v5 = vpop.f32.mrb[13].mxu0  ;;  %v487_v37 = vpop.permute.xlu0 %486 }
 0x12f   :  { %v362_v7 = vadd.f32 %v361_v5, %v133_v53  ;;  %v1154_v8 = vpop.f32.mrb[14].mxu0  ;;  %1163 = vmatprep.subr.bf16.mxu1 %v428_v2  ;;  %v1575_v45 = vpop.permute.xlu1 %561  ;;  %p1256_p3 = por %p1255_p2, %p1254_p1 }
 0x130   :  { %v373_v9 = vadd.f32 %v1154_v8, %v148_v6  ;;  %v364_v10 = vpop.f32.mrb[15].mxu0  ;;  %1164 = vmatpush3.bf16.msra.mxu1 %v428_v2  ;;  %v390_v12 = vmax.f32 %v370_v4, 0.0 }
 0x131   :  { %v365_v11 = vadd.f32 %v364_v10, %v138_v58  ;;  %1165 = vmatprep.subr.bf16.mxu1 %v429_v0  ;;  %v388_v14 = vmax.f32 %v362_v7, 0.0  ;;  %p1257_p4 = pnand %p1256_p3, %p1250_p0 }
 0x132   :  { %v391_v13 = vmax.f32 %v373_v9, 0.0  ;;  %v492_v38 = vpop.permute.xlu0 %491 }
 0x133   :  { %v389_v15 = vmax.f32 %v365_v11, 0.0  ;;  %v1577_v47 = vpop.permute.xlu1 %566 }
 0x134   :  { %v431_v16 = vpack.c.bf16 %v391_v13, %v390_v12  ;;  %1166 = vmatpush3.bf16.msra.mxu1 %v429_v0 }
 0x135   :  { %v430_v17 = vpack.c.bf16 %v389_v15, %v388_v14 }
 0x136   :  { %v497_v40 = vpop.permute.xlu0 %496 }
 0x137   :  { %1167 = vmatprep.subr.bf16.mxu1 %v430_v17  ;;  %v1579_v49 = vpop.permute.xlu1 %571 }
 0x138   :  { %1168 = vmatpush3.bf16.msra.mxu1 %v430_v17 }
 0x139   :  { %1169 = vmatprep.subr.bf16.mxu1 %v431_v16 }
 0x13a   :  { %v502_v42 = vpop.permute.xlu0 %501 }
 0x13b   :  { %v1581_v58 = vpop.permute.xlu1 %576 }
 0x13c   :  { %1170 = vmatpush3.bf16.msra.mxu1 %v431_v16 }
 0x13e   :  { %v507_v44 = vpop.permute.xlu0 %506 }
 0x13f   :  { %1172 = vmatmul.mubr.bf16.vlgmr.msra.gmra.mrb[0].mxu1 %v1232_v18  ;;  %v1595_v5 = vpop.permute.xlu1 %581 }
 0x140   :  { %1175 = vmatprep.mubr.bf16.mxu1 %v1233_v19 }
 0x142   :  { %v512_v46 = vpop.permute.xlu0 %511 }
 0x146   :  { %v517_v48 = vpop.permute.xlu0 %516 }
 0x147   :  { %1176 = vmatmul.mubr.bf16.gmra.mrb[4].mxu1 %v1234_v20 }
 0x148   :  { %1179 = vmatprep.mubr.bf16.mxu1 %v1235_v21 }
 0x14a   :  { %v522_v55 = vpop.permute.xlu0 %521 }
 0x14e   :  { %v527_v3 = vpop.permute.xlu0 %526 }
 0x14f   :  { %1180 = vmatmul.mubr.bf16.gmra.mrb[8].mxu1 %v1236_v22  ;;  %v1609_v22 = vpop.permute.xlu1 %586 }
 0x150   :  { %1183 = vmatprep.mubr.bf16.mxu1 %v1237_v23 }
 0x152   :  { %v532_v21 = vpop.permute.xlu0 %531 }
 0x157   :  { %1184 = vmatmul.mubr.bf16.gmra.mrb[12].mxu1 %v1238_v24 }
 0x158   :  { %1187 = vmatprep.mubr.bf16.mxu1 %v1239_v25 }
 0x15f   :  { %1188 = vmatmul.mubr.bf16.gmra.mrb[16].mxu1 %v1240_v26 }
 0x160   :  { %1191 = vmatprep.mubr.bf16.mxu1 %v1241_v27 }
 0x167   :  { %1192 = vmatmul.mubr.bf16.gmra.mrb[20].mxu1 %v1242_v28 }
 0x168   :  { %1195 = vmatprep.mubr.bf16.mxu1 %v1243_v29 }
 0x16f   :  { %1196 = vmatmul.mubr.bf16.gmra.mrb[24].mxu1 %v1244_v30 }
 0x170   :  { %1199 = vmatprep.mubr.bf16.mxu1 %v1245_v31 }
 0x177   :  { %1200 = vmatmul.mubr.bf16.gmra.mrb[28].mxu1 %v1246_v32 }
 0x212   :  { %v1173_v50 = vpop.f32.mrb[0].mxu1 }
 0x213   :  { %v754_v51 = vpop.f32.mrb[1].mxu1  ;;  %v763_v52 = vadd.f32 %v1173_v50, %v477_v35 }
 0x214   :  { %v755_v53 = vadd.f32 %v754_v51, %v467_v33  ;;  %v1174_v54 = vpop.f32.mrb[2].mxu1 }
 0x215   :  { %v766_v56 = vadd.f32 %v1174_v54, %v482_v36  ;;  %v757_v57 = vpop.f32.mrb[3].mxu1  ;;  %v1585_v61 = vmax.f32 %v763_v52, 0.0 }
 0x216   :  { %v1583_v59 = vmax.f32 %v755_v53, 0.0  ;;  %v758_v60 = vadd.f32 %v757_v57, %v472_v39 }
 0x217   :  { %v1589_v63 = vmax.f32 %v766_v56, 0.0  ;;  %v915_v6 = vmul.f32 %v1585_v61, %v1585_v61 }
 0x218   :  { %v1587_v62 = vmax.f32 %v758_v60, 0.0  ;;  %v913_v0 = vmul.f32 %v1583_v59, %v1583_v59 }
 0x219   :  { %v916_v11 = vmul.f32 %v1589_v63, %v1589_v63 }
 0x21a   :  { %v914_v1 = vmul.f32 %v1587_v62, %v1587_v62  ;;  %v1177_v2 = vpop.f32.mrb[4].mxu1 }
 0x21b   :  { %v770_v4 = vpop.f32.mrb[5].mxu1  ;;  %v779_v8 = vadd.f32 %v1177_v2, %v497_v40  ;;  %v537_v40 = vpop.permute.xlu0 %536 }
 0x21c   :  { %v945_v7 = vadd.f32 %v914_v1, %v913_v0  ;;  %v771_v9 = vadd.f32 %v770_v4, %v487_v37  ;;  %v1178_v10 = vpop.f32.mrb[6].mxu1 }
 0x21d   :  { %v773_v12 = vpop.f32.mrb[7].mxu1  ;;  %v782_v15 = vadd.f32 %v1178_v10, %v502_v42  ;;  %v1603_v17 = vmax.f32 %v779_v8, 0.0  ;;  %v1621_v42 = vpop.permute.xlu1 %591 }
 0x21e   :  { %v946_v13 = vadd.f32 %v945_v7, %v915_v6  ;;  %v1601_v14 = vmax.f32 %v771_v9, 0.0  ;;  %v774_v16 = vadd.f32 %v773_v12, %v492_v38 }
 0x21f   :  { %v1611_v24 = vmax.f32 %v782_v15, 0.0  ;;  %v919_v28 = vmul.f32 %v1603_v17, %v1603_v17  ;;  %v542_v2 = vpop.permute.xlu0 %541 }
 0x220   :  { %v917_v18 = vmul.f32 %v1601_v14, %v1601_v14  ;;  %v947_v19 = vadd.f32 %v946_v13, %v916_v11  ;;  %v1607_v20 = vmax.f32 %v774_v16, 0.0 }
 0x221   :  { %v920_v36 = vmul.f32 %v1611_v24, %v1611_v24  ;;  %v1637_v7 = vpop.permute.xlu1 %596 }
 0x222   :  { %v948_v23 = vadd.f32 %v947_v19, %v917_v18  ;;  %v918_v25 = vmul.f32 %v1607_v20, %v1607_v20  ;;  %v1181_v26 = vpop.f32.mrb[8].mxu1 }
 0x223   :  { %v786_v27 = vpop.f32.mrb[9].mxu1  ;;  %v795_v30 = vadd.f32 %v1181_v26, %v517_v48 }
 0x224   :  { %v949_v29 = vadd.f32 %v948_v23, %v918_v25  ;;  %v787_v31 = vadd.f32 %v786_v27, %v507_v44  ;;  %v1182_v32 = vpop.f32.mrb[10].mxu1 }
 0x225   :  { %v798_v33 = vadd.f32 %v1182_v32, %v522_v55  ;;  %v789_v35 = vpop.f32.mrb[11].mxu1  ;;  %v1623_v50 = vmax.f32 %v795_v30, 0.0  ;;  %v602_v27 = vpop.permute.xlu1 %601 }
 0x226   :  { %v950_v37 = vadd.f32 %v949_v29, %v919_v28  ;;  %v1619_v38 = vmax.f32 %v787_v31, 0.0  ;;  %v790_v39 = vadd.f32 %v789_v35, %v512_v46 }
 0x227   :  { %v1629_v52 = vmax.f32 %v798_v33, 0.0  ;;  %v923_v46 = vmul.f32 %v1623_v50, %v1623_v50 }
 0x228   :  { %v921_v51 = vmul.f32 %v1619_v38, %v1619_v38  ;;  %v951_v48 = vadd.f32 %v950_v37, %v920_v36  ;;  %v1627_v44 = vmax.f32 %v790_v39, 0.0 }
 0x229   :  { %v924_v4 = vmul.f32 %v1629_v52, %v1629_v52 }
 0x22a   :  { %v952_v53 = vadd.f32 %v951_v48, %v921_v51  ;;  %v922_v54 = vmul.f32 %v1627_v44, %v1627_v44  ;;  %v1185_v55 = vpop.f32.mrb[12].mxu1 }
 0x22b   :  { %v802_v56 = vpop.f32.mrb[13].mxu1  ;;  %v811_v60 = vadd.f32 %v1185_v55, %v537_v40 }
 0x22c   :  { %v953_v57 = vadd.f32 %v952_v53, %v922_v54  ;;  %v803_v0 = vadd.f32 %v802_v56, %v527_v3  ;;  %v1186_v1 = vpop.f32.mrb[14].mxu1  ;;  %v1664_v54 = vpop.permute.xlu1 %606 }
 0x22d   :  { %v805_v6 = vpop.f32.mrb[15].mxu1  ;;  %v814_v10 = vadd.f32 %v1186_v1, %v542_v2  ;;  %v1641_v12 = vmax.f32 %v811_v60, 0.0 }
 0x22e   :  { %v954_v8 = vadd.f32 %v953_v57, %v923_v46  ;;  %v1639_v9 = vmax.f32 %v803_v0, 0.0  ;;  %v806_v11 = vadd.f32 %v805_v6, %v532_v21 }
 0x22f   :  { %v1647_v18 = vmax.f32 %v814_v10, 0.0  ;;  %v927_v21 = vmul.f32 %v1641_v12, %v1641_v12 }
 0x230   :  { %v925_v13 = vmul.f32 %v1639_v9, %v1639_v9  ;;  %v955_v15 = vadd.f32 %v954_v8, %v924_v4  ;;  %v1645_v3 = vmax.f32 %v806_v11, 0.0 }
 0x231   :  { %v928_v35 = vmul.f32 %v1647_v18, %v1647_v18 }
 0x232   :  { %v956_v16 = vadd.f32 %v955_v15, %v925_v13  ;;  %v926_v19 = vmul.f32 %v1645_v3, %v1645_v3  ;;  %v1189_v23 = vpop.f32.mrb[16].mxu1  ;;  %v612_v15 = vpop.permute.xlu1 %611 }
 0x233   :  { %v827_v25 = vadd.f32 %v1189_v23, %v1573_v43  ;;  %v818_v26 = vpop.f32.mrb[17].mxu1 }
 0x234   :  { %v957_v28 = vadd.f32 %v956_v16, %v926_v19  ;;  %v819_v29 = vadd.f32 %v818_v26, %v1569_v34  ;;  %v1190_v30 = vpop.f32.mrb[18].mxu1 }
 0x235   :  { %v899_v31 = vmax.f32 %v827_v25, 0.0  ;;  %v830_v32 = vadd.f32 %v1190_v30, %v1575_v45  ;;  %v821_v33 = vpop.f32.mrb[19].mxu1 }
 0x236   :  { %v958_v36 = vadd.f32 %v957_v28, %v927_v21  ;;  %v897_v37 = vmax.f32 %v819_v29, 0.0  ;;  %v822_v43 = vadd.f32 %v821_v33, %v1571_v41 }
 0x237   :  { %v989_v39 = vmul.f32 %v899_v31, %v1585_v61  ;;  %v900_v40 = vmax.f32 %v830_v32, 0.0  ;;  %v931_v60 = vmul.f32 %v899_v31, %v899_v31 }
 0x238   :  { %v1660_v51 = vadd.f32 %v958_v36, %v928_v35  ;;  %v987_v48 = vmul.f32 %v897_v37, %v1583_v59  ;;  %v898_v34 = vmax.f32 %v822_v43, 0.0  ;;  %v929_v45 = vmul.f32 %v897_v37, %v897_v37 }
 0x239   :  { %v990_v53 = vmul.f32 %v900_v40, %v1589_v63  ;;  %v932_v6 = vmul.f32 %v900_v40, %v900_v40 }
 0x23a   :  { %v930_v55 = vmul.f32 %v898_v34, %v898_v34  ;;  %v988_v56 = vmul.f32 %v898_v34, %v1587_v62  ;;  %v1193_v46 = vpop.f32.mrb[20].mxu1 }
 0x23b   :  { %v843_v57 = vadd.f32 %v1193_v46, %v1581_v58  ;;  %v834_v41 = vpop.f32.mrb[21].mxu1 }
 0x23c   :  { %v966_v61 = vadd.f32 %v930_v55, %v929_v45  ;;  %v1003_v0 = vadd.f32 %v988_v56, %v987_v48  ;;  %v835_v1 = vadd.f32 %v834_v41, %v1577_v47  ;;  %v1194_v2 = vpop.f32.mrb[22].mxu1 }
 0x23d   :  { %v903_v59 = vmax.f32 %v843_v57, 0.0  ;;  %v846_v4 = vadd.f32 %v1194_v2, %v1595_v5  ;;  %v837_v63 = vpop.f32.mrb[23].mxu1 }
 0x23e   :  { %v967_v8 = vadd.f32 %v966_v61, %v931_v60  ;;  %v1004_v10 = vadd.f32 %v1003_v0, %v989_v39  ;;  %v901_v11 = vmax.f32 %v835_v1, 0.0  ;;  %v838_v58 = vadd.f32 %v837_v63, %v1579_v49 }
 0x23f   :  { %v993_v62 = vmul.f32 %v903_v59, %v1603_v17  ;;  %v904_v13 = vmax.f32 %v846_v4, 0.0  ;;  %v935_v32 = vmul.f32 %v903_v59, %v903_v59 }
 0x240   :  { %v933_v16 = vmul.f32 %v901_v11, %v901_v11  ;;  %v968_v19 = vadd.f32 %v967_v8, %v932_v6  ;;  %v991_v23 = vmul.f32 %v901_v11, %v1601_v14  ;;  %v1005_v47 = vadd.f32 %v1004_v10, %v990_v53 }
 0x241   :  { %v994_v25 = vmul.f32 %v904_v13, %v1611_v24  ;;  %v902_v26 = vmax.f32 %v838_v58, 0.0  ;;  %v617_v24 = vpop.permute.xlu1 %616  ;;  %v936_v48 = vmul.f32 %v904_v13, %v904_v13 }
 0x242   :  { %v969_v5 = vadd.f32 %v968_v19, %v933_v16  ;;  %v1197_v21 = vpop.f32.mrb[24].mxu1  ;;  %v1006_v28 = vadd.f32 %v1005_v47, %v991_v23 }
 0x243   :  { %v934_v29 = vmul.f32 %v902_v26, %v902_v26  ;;  %v992_v30 = vmul.f32 %v902_v26, %v1607_v20  ;;  %v859_v17 = vadd.f32 %v1197_v21, %v1637_v7  ;;  %v850_v31 = vpop.f32.mrb[25].mxu1 }
 0x244   :  { %v851_v49 = vadd.f32 %v850_v31, %v1609_v22  ;;  %v1198_v33 = vpop.f32.mrb[26].mxu1 }
 0x245   :  { %v970_v35 = vadd.f32 %v969_v5, %v934_v29  ;;  %v1007_v36 = vadd.f32 %v1006_v28, %v992_v30  ;;  %v907_v14 = vmax.f32 %v859_v17, 0.0  ;;  %v862_v37 = vadd.f32 %v1198_v33, %v602_v27  ;;  %v853_v43 = vpop.f32.mrb[27].mxu1  ;;  %v622_v2 = vpop.permute.xlu1 %621 }
 0x246   :  { %v905_v39 = vmax.f32 %v851_v49, 0.0  ;;  %v854_v40 = vadd.f32 %v853_v43, %v1621_v42 }
 0x247   :  { %v971_v34 = vadd.f32 %v970_v35, %v935_v32  ;;  %v1008_v53 = vadd.f32 %v1007_v36, %v993_v62  ;;  %v997_v20 = vmul.f32 %v907_v14, %v1623_v50  ;;  %v908_v55 = vmax.f32 %v862_v37, 0.0 }
 0x248   :  { %v937_v7 = vmul.f32 %v905_v39, %v905_v39  ;;  %v995_v45 = vmul.f32 %v905_v39, %v1619_v38  ;;  %v906_v22 = vmax.f32 %v854_v40, 0.0  ;;  %v939_v59 = vmul.f32 %v907_v14, %v907_v14 }
 0x249   :  { %v972_v56 = vadd.f32 %v971_v34, %v936_v48  ;;  %v1009_v46 = vadd.f32 %v1008_v53, %v994_v25  ;;  %v998_v57 = vmul.f32 %v908_v55, %v1629_v52  ;;  %v940_v62 = vmul.f32 %v908_v55, %v908_v55 }
 0x24a   :  { %v938_v27 = vmul.f32 %v906_v22, %v906_v22  ;;  %v996_v41 = vmul.f32 %v906_v22, %v1627_v44  ;;  %v1201_v60 = vpop.f32.mrb[28].mxu1 }
 0x24b   :  { %v973_v61 = vadd.f32 %v972_v56, %v937_v7  ;;  %v1010_v42 = vadd.f32 %v1009_v46, %v995_v45  ;;  %v875_v0 = vadd.f32 %v1201_v60, %v617_v24  ;;  %v866_v1 = vpop.f32.mrb[29].mxu1 }
 0x24c   :  { %v867_v50 = vadd.f32 %v866_v1, %v1664_v54  ;;  %v1202_v4 = vpop.f32.mrb[30].mxu1  ;;  %v960_v54 = vrot.slane %v1660_v51, 4 }
 0x24d   :  { %v974_v38 = vadd.f32 %v973_v61, %v938_v27  ;;  %v1011_v63 = vadd.f32 %v1010_v42, %v996_v41  ;;  %v911_v6 = vmax.f32 %v875_v0, 0.0  ;;  %v878_v8 = vadd.f32 %v1202_v4, %v622_v2  ;;  %v869_v10 = vpop.f32.mrb[31].mxu1 }
 0x24e   :  { %v909_v11 = vmax.f32 %v867_v50, 0.0  ;;  %v870_v52 = vadd.f32 %v869_v10, %v612_v15  ;;  %v961_v30 = vadd.f32 %v960_v54, %v1660_v51 }
 0x24f   :  { %v975_v13 = vadd.f32 %v974_v38, %v939_v59  ;;  %v1012_v44 = vadd.f32 %v1011_v63, %v997_v20  ;;  %v1001_v58 = vmul.f32 %v911_v6, %v1641_v12  ;;  %v912_v23 = vmax.f32 %v878_v8, 0.0 }
 0x250   :  { %v941_v16 = vmul.f32 %v909_v11, %v909_v11  ;;  %v999_v19 = vmul.f32 %v909_v11, %v1639_v9  ;;  %v910_v47 = vmax.f32 %v870_v52, 0.0  ;;  %v943_v17 = vmul.f32 %v911_v6, %v911_v6 }
 0x251   :  { %v976_v25 = vadd.f32 %v975_v13, %v940_v62  ;;  %v1013_v26 = vadd.f32 %v1012_v44, %v998_v57  ;;  %v1002_v5 = vmul.f32 %v912_v23, %v1647_v18  ;;  %v944_v32 = vmul.f32 %v912_v23, %v912_v23 }
 0x252   :  { %v942_v21 = vmul.f32 %v910_v47, %v910_v47  ;;  %v1000_v28 = vmul.f32 %v910_v47, %v1645_v3  ;;  %v962_v33 = vrot.slane %v961_v30, 2 }
 0x253   :  { %v977_v15 = vadd.f32 %v976_v25, %v941_v16  ;;  %v1014_v29 = vadd.f32 %v1013_v26, %v999_v19 }
 0x254   :  { %v963_v37 = vadd.f32 %v962_v33, %v961_v30 }
 0x255   :  { %v978_v12 = vadd.f32 %v977_v15, %v942_v21  ;;  %v1015_v31 = vadd.f32 %v1014_v29, %v1000_v28 }
 0x256   :  { %v964_v39 = vrot.slane %v963_v37, 1 }
 0x257   :  { %v979_v9 = vadd.f32 %v978_v12, %v943_v17  ;;  %v1016_v49 = vadd.f32 %v1015_v31, %v1001_v58 }
 0x258   :  { %v965_v34 = vadd.f32 %v964_v39, %v963_v37 }
 0x259   :  { %v980_v35 = vadd.f32 %v979_v9, %v944_v32  ;;  %v1017_v36 = vadd.f32 %v1016_v49, %v1002_v5 }
 0x25b   :  { %v981_v14 = vrot.slane %v980_v35, 4  ;;  %v1018_v24 = vrot.slane %v1017_v36, 4 }
 0x25d   :  { %v982_v43 = vadd.f32 %v981_v14, %v980_v35  ;;  %v1019_v48 = vadd.f32 %v1018_v24, %v1017_v36 }
 0x25f   :  { %v983_v18 = vrot.slane %v982_v43, 2  ;;  %v1020_v20 = vrot.slane %v1019_v48, 2 }
 0x261   :  { %v984_v3 = vadd.f32 %v983_v18, %v982_v43  ;;  %v1021_v45 = vadd.f32 %v1020_v20, %v1019_v48 }
 0x263   :  { %v985_v40 = vrot.slane %v984_v3, 1  ;;  %v1022_v55 = vrot.slane %v1021_v45, 1 }
 0x265   :  { %v986_v51 = vadd.f32 %v985_v40, %v984_v3  ;;  %v1023_v22 = vadd.f32 %v1022_v55, %v1021_v45 }
 0x267   :  { %v1024_v53 = vmul.f32 %v986_v51, %v965_v34 }
 0x269   :  { %v1025_v7 = vadd.f32 1e-12, %v1024_v53 }
 0x26b   :  { %1247 = vrsqrt.f32 %v1025_v7 }
 0x275   :  { %v1248_v56 = vpop.eup %1247 }
 0x276   :  { %v1027_v46 = vmul.f32 %v1248_v56, %v1023_v22 }
 0x278   :  { %1028 = vst [vmem:[#allocation2] sm:$0x1] %v1027_v46 }
 0x279   :  { %1260 = shalt.err (!%p1257_p4)
}
 0x27a   :  { %s1261_s2 = scalar_lea.hbm %s1706_s5, 16 }
 0x27b   :  { %p1262_p5 = scmp.ne.s32.totalorder %s1706_s5, %s1261_s2  ;;  %p1265_p6 = scmp.lt.u32.totalorder %s1261_s2, %s1706_s5 }
 0x27d   :  { %p1267_p7 = pnand %p1265_p6, %p1262_p5 }
 0x27f   :  { %1270 = shalt.err (!%p1267_p7)
}
 0x280   :  { %1038 = dma.vmem_to_hbm [thread:$0]  %s1036_s16, 16, %s1706_s5, [#allocation3]  }
 0x281   :  { %1271 = dma.done.wait [#allocation3], 16  }
 0x282   :  { %1272 = vsyncadd [#allocation3], 4294967280 }
 0x283   :  { %1042 = vsyncpa [#allocation3], 1 }

</bundles_post_ra>
